<compile_context>
chip_gen: v5e
topology: v5e:2x2
jax: 0.10.0
libtpu: 0.0.40
codegen_flags: <defaults>
</compile_context>

<pallas_src>
import functools

import jax
import jax.numpy as jnp
from jax.experimental import pallas as pl
from jax.experimental.pallas import tpu as pltpu


def _jaccard_kernel(pred_ref, tgt_ref, out_ref,
                    inter_acc, denom_acc,
                    *, s_total, tile, inner, n_inner, ragged, simple):
    s = pl.program_id(1)

    @pl.when(s == 0)
    def _init():
        inter_acc[...] = jnp.zeros_like(inter_acc)
        denom_acc[...] = jnp.zeros_like(denom_acc)

    if simple:
        # Degenerate tiny-spatial case (S < 128): single block, direct row reduce.
        p = pred_ref[...].astype(jnp.float32)
        t = tgt_ref[...].astype(jnp.float32)
        inter_acc[...] += jnp.sum(p * t, axis=1, keepdims=True)
        denom_acc[...] += jnp.sum(p * p + t * t, axis=1, keepdims=True)
    else:
        tr = pred_ref.shape[0]
        n_fold = inner // 128
        if ragged:
            # Hoisted once per grid step (JAX does not CSE broadcasts).
            lane_iota = jax.lax.broadcasted_iota(jnp.int32, (tr, inner), 1)
            tile_base = s * tile
        # Static unroll over 128-aligned chunks of the VMEM-resident block:
        # keeps intermediates small (no whole-block values) and keeps the hot
        # path on the VPU (no per-step cross-lane XLU reductions).
        for j in range(n_inner):
            c0 = j * inner
            pc = pred_ref[:, c0:c0 + inner].astype(jnp.float32)
            tc = tgt_ref[:, c0:c0 + inner].astype(jnp.float32)
            if ragged:
                valid = (tile_base + c0 + lane_iota) < s_total
                pc = jnp.where(valid, pc, 0.0)
                tc = jnp.where(valid, tc, 0.0)
            pt = pc * tc
            dd = pc * pc + tc * tc
            a_pt = pt[:, 0:128]
            a_dd = dd[:, 0:128]
            for k in range(1, n_fold):       # 128-aligned static slices: VPU adds only
                sl = slice(k * 128, (k + 1) * 128)
                a_pt = a_pt + pt[:, sl]
                a_dd = a_dd + dd[:, sl]
            inter_acc[...] += a_pt           # lane-dense (tr, 128) accumulator stores
            denom_acc[...] += a_dd

    @pl.when(s == pl.num_programs(1) - 1)
    def _finalize():
        smooth = jnp.float32(1.0)
        if simple:
            inter = inter_acc[...]
            den = denom_acc[...]
        else:
            # The only cross-lane reductions: once per row block.
            inter = jnp.sum(inter_acc[...], axis=1, keepdims=True)
            den = jnp.sum(denom_acc[...], axis=1, keepdims=True)
        ratio = inter / (den - inter + smooth)                   # (tr, 1) per-row jaccard
        out_ref[...] = jnp.broadcast_to(ratio, out_ref.shape)    # lane-dense write


def jaccard_loss(pred, target, *, block_bytes=4 * 1024 * 1024):
    """Pallas implementation of JaccardLoss.forward for 5-D (B,C,D,H,W) inputs."""
    assert pred.shape == target.shape and pred.ndim == 5
    B, C, D, H, W = pred.shape
    BC = B * C
    S = D * H * W

    # No wrapper pad / upcast: reshape only (free), native dtype streamed from HBM.
    p2d = pred.reshape(BC, S)
    t2d = target.reshape(BC, S)
    itemsize = jnp.dtype(p2d.dtype).itemsize

    # Row block: multiple of 8 (or the full B*C), capped at 64 to bound vreg
    # pressure; >=2 blocks when possible so megacore can shard the parallel axis.
    if BC <= 8:
        tr = BC
    else:
        tr = min(64, max(8, (BC // 2) // 8 * 8))
    n_row_blocks = (BC + tr - 1) // tr

    # Spatial tile: 128-lane multiple sized so one input block is ~block_bytes;
    # the ragged tail is masked inside the kernel (no padded copies of inputs).
    if S < 128:
        tile, inner, simple = S, None, True
    elif S < 1024:
        tile, inner, simple = (S // 128) * 128, 128, False
    else:
        target_elems = max(1024, (block_bytes // max(1, tr * itemsize)) // 1024 * 1024)
        tile = min((S // 1024) * 1024, target_elems, 128 * 1024)
        inner = 1024 if tr <= 8 else (512 if tr <= 16 else (256 if tr <= 32 else 128))
        simple = False
    ragged = (not simple) and (S % tile != 0)
    n_inner = None if simple else tile // inner
    n_s_tiles = (S + tile - 1) // tile

    kernel = functools.partial(
        _jaccard_kernel, s_total=S, tile=tile, inner=inner, n_inner=n_inner,
        ragged=ragged, simple=simple)

    acc_shape = (tr, 1) if simple else (tr, 128)

    ratios = pl.pallas_call(
        kernel,
        out_shape=jax.ShapeDtypeStruct((BC, 128), jnp.float32),
        grid_spec=pltpu.PrefetchScalarGridSpec(
            num_scalar_prefetch=0,
            grid=(n_row_blocks, n_s_tiles),
            in_specs=[
                pl.BlockSpec((tr, tile), lambda r, s: (r, s)),
                pl.BlockSpec((tr, tile), lambda r, s: (r, s)),
            ],
            out_specs=pl.BlockSpec((tr, 128), lambda r, s: (r, 0)),
            scratch_shapes=[
                pltpu.VMEM(acc_shape, jnp.float32),   # sum(p*t)
                pltpu.VMEM(acc_shape, jnp.float32),   # sum(p^2 + t^2)
            ],
        ),
        compiler_params=pltpu.CompilerParams(
            dimension_semantics=("parallel", "arbitrary"),
            vmem_limit_bytes=32 * 1024 * 1024,
        ),
    )(p2d, t2d)

    # Tiny epilogue in plain JAX: per-(b,c) ratios -> scalar loss.
    # mean_b(1 - (1/C) * sum_c ratio) == 1 - sum(ratio) / (B*C)
    ratio = ratios[:, 0]
    return jnp.clip(1.0 - jnp.sum(ratio) / float(BC), 0.0, 1.0)


def jaccard_loss_ref(pred, target):
    """Pure-JAX reference mirroring the PyTorch module exactly."""
    smooth = 1.0
    C = pred.shape[1]
    jac = 0.0
    for i in range(C):
        p = pred[:, i]
        t = target[:, i]
        inter = jnp.sum(p * t, axis=(1, 2, 3))
        jac = jac + inter / (jnp.sum(p ** 2, axis=(1, 2, 3))
                             + jnp.sum(t ** 2, axis=(1, 2, 3))
                             - inter + smooth)
    jac = jac / C
    return jnp.clip(jnp.mean(1.0 - jac), 0.0, 1.0)


if __name__ == "__main__":
    key = jax.random.PRNGKey(0)
    k1, k2, k3, k4, k5, k6, k7, k8 = jax.random.split(key, 8)

    # Case 1: f32, spatial size a clean multiple of the lane tile.
    pred = jax.random.uniform(k1, (2, 4, 8, 16, 16), dtype=jnp.float32)
    target = (jax.random.uniform(k2, (2, 4, 8, 16, 16)) > 0.5).astype(jnp.float32)
    out = jax.block_until_ready(jaccard_loss(pred, target))
    ref = jaccard_loss_ref(pred, target)
    assert jnp.allclose(out, ref, rtol=1e-5, atol=1e-5), (out, ref)

    # Case 2: bf16 inputs, ragged spatial tail, B*C not a multiple of the row block.
    pred2 = jax.random.uniform(k3, (3, 3, 5, 15, 15), dtype=jnp.float32)
    target2 = (jax.random.uniform(k4, (3, 3, 5, 15, 15)) > 0.5).astype(jnp.float32)
    out2 = jax.block_until_ready(
        jaccard_loss(pred2.astype(jnp.bfloat16), target2.astype(jnp.bfloat16)))
    ref2 = jaccard_loss_ref(pred2.astype(jnp.bfloat16).astype(jnp.float32),
                            target2.astype(jnp.bfloat16).astype(jnp.float32))
    assert jnp.allclose(out2, ref2, rtol=1e-5, atol=1e-5), (out2, ref2)

    # Case 3: tiny spatial extent (< 128 lanes) -> degenerate single-block path.
    pred3 = jax.random.uniform(k5, (2, 2, 2, 4, 8), dtype=jnp.float32)
    target3 = (jax.random.uniform(k6, (2, 2, 2, 4, 8)) > 0.5).astype(jnp.float32)
    out3 = jax.block_until_ready(jaccard_loss(pred3, target3))
    ref3 = jaccard_loss_ref(pred3, target3)
    assert jnp.allclose(out3, ref3, rtol=1e-5, atol=1e-5), (out3, ref3)

    # Case 4: larger B*C (multiple 16-row blocks), ragged spatial tail.
    pred4 = jax.random.uniform(k7, (4, 8, 8, 12, 12), dtype=jnp.float32)
    target4 = (jax.random.uniform(k8, (4, 8, 8, 12, 12)) > 0.5).astype(jnp.float32)
    out4 = jax.block_until_ready(jaccard_loss(pred4, target4))
    ref4 = jaccard_loss_ref(pred4, target4)
    assert jnp.allclose(out4, ref4, rtol=1e-5, atol=1e-5), (out4, ref4)

    print("KERNEL_OK")
</pallas_src>

<mosaic_0001>
module attributes {stable_mosaic.version = 11 : i64} {
  func.func @_jaccard_kernel(%arg0: i32, %arg1: i32, %arg2: memref<8x2048xf32, #tpu.memory_space<vmem>>, %arg3: memref<8x2048xf32, #tpu.memory_space<vmem>>, %arg4: memref<8x128xf32, #tpu.memory_space<vmem>>, %arg5: memref<8x128xf32, #tpu.memory_space<vmem>>, %arg6: memref<8x128xf32, #tpu.memory_space<vmem>>) attributes {dimension_semantics = [#tpu.dimension_semantics<parallel>, #tpu.dimension_semantics<arbitrary>], iteration_bounds = array<i64: 1, 1>, scalar_prefetch = 0 : i64, scratch_operands = 2 : i64, tpu.core_type = #tpu.core_type<tc>, window_params = [{transform_indices = @transform_0, window_bounds = array<i64: 8, 2048>}, {transform_indices = @transform_1, window_bounds = array<i64: 8, 2048>}, {transform_indices = @transform_2, window_bounds = array<i64: 8, 128>}]} {
    %c0_i32 = arith.constant 0 : i32
    %0 = arith.cmpi eq, %arg1, %c0_i32 : i32
    %1 = arith.extui %0 : i1 to i32
    %c0_i32_0 = arith.constant 0 : i32
    %2 = arith.cmpi ne, %1, %c0_i32_0 : i32
    scf.if %2 {
      %cst = arith.constant 0.000000e+00 : f32
      %90 = vector.broadcast %cst : f32 to vector<8x128xf32>
      %c0_25 = arith.constant 0 : index
      %c0_26 = arith.constant 0 : index
      %91 = vector.load %arg5[%c0_25, %c0_26] : memref<8x128xf32, #tpu.memory_space<vmem>>, vector<8x128xf32>
      tpu.vector_store %arg5[%c0_25, %c0_26], %90 {strides = array<i32>} : memref<8x128xf32, #tpu.memory_space<vmem>>, vector<8x128xf32>,
      %cst_27 = arith.constant 0.000000e+00 : f32
      %92 = vector.broadcast %cst_27 : f32 to vector<8x128xf32>
      %c0_28 = arith.constant 0 : index
      %c0_29 = arith.constant 0 : index
      %93 = vector.load %arg6[%c0_28, %c0_29] : memref<8x128xf32, #tpu.memory_space<vmem>>, vector<8x128xf32>
      tpu.vector_store %arg6[%c0_28, %c0_29], %92 {strides = array<i32>} : memref<8x128xf32, #tpu.memory_space<vmem>>, vector<8x128xf32>,
    } else {
    }
    %c0 = arith.constant 0 : index
    %c0_1 = arith.constant 0 : index
    %3 = vector.load %arg2[%c0, %c0_1] : memref<8x2048xf32, #tpu.memory_space<vmem>>, vector<8x1024xf32>
    %c0_2 = arith.constant 0 : index
    %c0_3 = arith.constant 0 : index
    %4 = vector.load %arg3[%c0_2, %c0_3] : memref<8x2048xf32, #tpu.memory_space<vmem>>, vector<8x1024xf32>
    %5 = arith.mulf %3, %4 : vector<8x1024xf32>
    %6 = arith.mulf %3, %3 : vector<8x1024xf32>
    %7 = arith.mulf %4, %4 : vector<8x1024xf32>
    %8 = arith.addf %6, %7 : vector<8x1024xf32>
    %9 = vector.extract_strided_slice %5 {offsets = [0, 0], sizes = [8, 128], strides = [1, 1]} : vector<8x1024xf32> to vector<8x128xf32>
    %10 = vector.extract_strided_slice %8 {offsets = [0, 0], sizes = [8, 128], strides = [1, 1]} : vector<8x1024xf32> to vector<8x128xf32>
    %11 = vector.extract_strided_slice %5 {offsets = [0, 128], sizes = [8, 128], strides = [1, 1]} : vector<8x1024xf32> to vector<8x128xf32>
    %12 = arith.addf %9, %11 : vector<8x128xf32>
    %13 = vector.extract_strided_slice %8 {offsets = [0, 128], sizes = [8, 128], strides = [1, 1]} : vector<8x1024xf32> to vector<8x128xf32>
    %14 = arith.addf %10, %13 : vector<8x128xf32>
    %15 = vector.extract_strided_slice %5 {offsets = [0, 256], sizes = [8, 128], strides = [1, 1]} : vector<8x1024xf32> to vector<8x128xf32>
    %16 = arith.addf %12, %15 : vector<8x128xf32>
    %17 = vector.extract_strided_slice %8 {offsets = [0, 256], sizes = [8, 128], strides = [1, 1]} : vector<8x1024xf32> to vector<8x128xf32>
    %18 = arith.addf %14, %17 : vector<8x128xf32>
    %19 = vector.extract_strided_slice %5 {offsets = [0, 384], sizes = [8, 128], strides = [1, 1]} : vector<8x1024xf32> to vector<8x128xf32>
    %20 = arith.addf %16, %19 : vector<8x128xf32>
    %21 = vector.extract_strided_slice %8 {offsets = [0, 384], sizes = [8, 128], strides = [1, 1]} : vector<8x1024xf32> to vector<8x128xf32>
    %22 = arith.addf %18, %21 : vector<8x128xf32>
    %23 = vector.extract_strided_slice %5 {offsets = [0, 512], sizes = [8, 128], strides = [1, 1]} : vector<8x1024xf32> to vector<8x128xf32>
    %24 = arith.addf %20, %23 : vector<8x128xf32>
    %25 = vector.extract_strided_slice %8 {offsets = [0, 512], sizes = [8, 128], strides = [1, 1]} : vector<8x1024xf32> to vector<8x128xf32>
    %26 = arith.addf %22, %25 : vector<8x128xf32>
    %27 = vector.extract_strided_slice %5 {offsets = [0, 640], sizes = [8, 128], strides = [1, 1]} : vector<8x1024xf32> to vector<8x128xf32>
    %28 = arith.addf %24, %27 : vector<8x128xf32>
    %29 = vector.extract_strided_slice %8 {offsets = [0, 640], sizes = [8, 128], strides = [1, 1]} : vector<8x1024xf32> to vector<8x128xf32>
    %30 = arith.addf %26, %29 : vector<8x128xf32>
    %31 = vector.extract_strided_slice %5 {offsets = [0, 768], sizes = [8, 128], strides = [1, 1]} : vector<8x1024xf32> to vector<8x128xf32>
    %32 = arith.addf %28, %31 : vector<8x128xf32>
    %33 = vector.extract_strided_slice %8 {offsets = [0, 768], sizes = [8, 128], strides = [1, 1]} : vector<8x1024xf32> to vector<8x128xf32>
    %34 = arith.addf %30, %33 : vector<8x128xf32>
    %35 = vector.extract_strided_slice %5 {offsets = [0, 896], sizes = [8, 128], strides = [1, 1]} : vector<8x1024xf32> to vector<8x128xf32>
    %36 = arith.addf %32, %35 : vector<8x128xf32>
    %37 = vector.extract_strided_slice %8 {offsets = [0, 896], sizes = [8, 128], strides = [1, 1]} : vector<8x1024xf32> to vector<8x128xf32>
    %38 = arith.addf %34, %37 : vector<8x128xf32>
    %c0_4 = arith.constant 0 : index
    %c0_5 = arith.constant 0 : index
    %39 = vector.load %arg5[%c0_4, %c0_5] : memref<8x128xf32, #tpu.memory_space<vmem>>, vector<8x128xf32>
    %40 = arith.addf %39, %36 : vector<8x128xf32>
    %c0_6 = arith.constant 0 : index
    %c0_7 = arith.constant 0 : index
    %41 = vector.load %arg5[%c0_6, %c0_7] : memref<8x128xf32, #tpu.memory_space<vmem>>, vector<8x128xf32>
    tpu.vector_store %arg5[%c0_6, %c0_7], %40 {strides = array<i32>} : memref<8x128xf32, #tpu.memory_space<vmem>>, vector<8x128xf32>,
    %c0_8 = arith.constant 0 : index
    %c0_9 = arith.constant 0 : index
    %42 = vector.load %arg6[%c0_8, %c0_9] : memref<8x128xf32, #tpu.memory_space<vmem>>, vector<8x128xf32>
    %43 = arith.addf %42, %38 : vector<8x128xf32>
    %c0_10 = arith.constant 0 : index
    %c0_11 = arith.constant 0 : index
    %44 = vector.load %arg6[%c0_10, %c0_11] : memref<8x128xf32, #tpu.memory_space<vmem>>, vector<8x128xf32>
    tpu.vector_store %arg6[%c0_10, %c0_11], %43 {strides = array<i32>} : memref<8x128xf32, #tpu.memory_space<vmem>>, vector<8x128xf32>,
    %c0_12 = arith.constant 0 : index
    %c1024 = arith.constant 1024 : index
    %45 = vector.load %arg2[%c0_12, %c1024] : memref<8x2048xf32, #tpu.memory_space<vmem>>, vector<8x1024xf32>
    %c0_13 = arith.constant 0 : index
    %c1024_14 = arith.constant 1024 : index
    %46 = vector.load %arg3[%c0_13, %c1024_14] : memref<8x2048xf32, #tpu.memory_space<vmem>>, vector<8x1024xf32>
    %47 = arith.mulf %45, %46 : vector<8x1024xf32>
    %48 = arith.mulf %45, %45 : vector<8x1024xf32>
    %49 = arith.mulf %46, %46 : vector<8x1024xf32>
    %50 = arith.addf %48, %49 : vector<8x1024xf32>
    %51 = vector.extract_strided_slice %47 {offsets = [0, 0], sizes = [8, 128], strides = [1, 1]} : vector<8x1024xf32> to vector<8x128xf32>
    %52 = vector.extract_strided_slice %50 {offsets = [0, 0], sizes = [8, 128], strides = [1, 1]} : vector<8x1024xf32> to vector<8x128xf32>
    %53 = vector.extract_strided_slice %47 {offsets = [0, 128], sizes = [8, 128], strides = [1, 1]} : vector<8x1024xf32> to vector<8x128xf32>
    %54 = arith.addf %51, %53 : vector<8x128xf32>
    %55 = vector.extract_strided_slice %50 {offsets = [0, 128], sizes = [8, 128], strides = [1, 1]} : vector<8x1024xf32> to vector<8x128xf32>
    %56 = arith.addf %52, %55 : vector<8x128xf32>
    %57 = vector.extract_strided_slice %47 {offsets = [0, 256], sizes = [8, 128], strides = [1, 1]} : vector<8x1024xf32> to vector<8x128xf32>
    %58 = arith.addf %54, %57 : vector<8x128xf32>
    %59 = vector.extract_strided_slice %50 {offsets = [0, 256], sizes = [8, 128], strides = [1, 1]} : vector<8x1024xf32> to vector<8x128xf32>
    %60 = arith.addf %56, %59 : vector<8x128xf32>
    %61 = vector.extract_strided_slice %47 {offsets = [0, 384], sizes = [8, 128], strides = [1, 1]} : vector<8x1024xf32> to vector<8x128xf32>
    %62 = arith.addf %58, %61 : vector<8x128xf32>
    %63 = vector.extract_strided_slice %50 {offsets = [0, 384], sizes = [8, 128], strides = [1, 1]} : vector<8x1024xf32> to vector<8x128xf32>
    %64 = arith.addf %60, %63 : vector<8x128xf32>
    %65 = vector.extract_strided_slice %47 {offsets = [0, 512], sizes = [8, 128], strides = [1, 1]} : vector<8x1024xf32> to vector<8x128xf32>
    %66 = arith.addf %62, %65 : vector<8x128xf32>
    %67 = vector.extract_strided_slice %50 {offsets = [0, 512], sizes = [8, 128], strides = [1, 1]} : vector<8x1024xf32> to vector<8x128xf32>
    %68 = arith.addf %64, %67 : vector<8x128xf32>
    %69 = vector.extract_strided_slice %47 {offsets = [0, 640], sizes = [8, 128], strides = [1, 1]} : vector<8x1024xf32> to vector<8x128xf32>
    %70 = arith.addf %66, %69 : vector<8x128xf32>
    %71 = vector.extract_strided_slice %50 {offsets = [0, 640], sizes = [8, 128], strides = [1, 1]} : vector<8x1024xf32> to vector<8x128xf32>
    %72 = arith.addf %68, %71 : vector<8x128xf32>
    %73 = vector.extract_strided_slice %47 {offsets = [0, 768], sizes = [8, 128], strides = [1, 1]} : vector<8x1024xf32> to vector<8x128xf32>
    %74 = arith.addf %70, %73 : vector<8x128xf32>
    %75 = vector.extract_strided_slice %50 {offsets = [0, 768], sizes = [8, 128], strides = [1, 1]} : vector<8x1024xf32> to vector<8x128xf32>
    %76 = arith.addf %72, %75 : vector<8x128xf32>
    %77 = vector.extract_strided_slice %47 {offsets = [0, 896], sizes = [8, 128], strides = [1, 1]} : vector<8x1024xf32> to vector<8x128xf32>
    %78 = arith.addf %74, %77 : vector<8x128xf32>
    %79 = vector.extract_strided_slice %50 {offsets = [0, 896], sizes = [8, 128], strides = [1, 1]} : vector<8x1024xf32> to vector<8x128xf32>
    %80 = arith.addf %76, %79 : vector<8x128xf32>
    %c0_15 = arith.constant 0 : index
    %c0_16 = arith.constant 0 : index
    %81 = vector.load %arg5[%c0_15, %c0_16] : memref<8x128xf32, #tpu.memory_space<vmem>>, vector<8x128xf32>
    %82 = arith.addf %81, %78 : vector<8x128xf32>
    %c0_17 = arith.constant 0 : index
    %c0_18 = arith.constant 0 : index
    %83 = vector.load %arg5[%c0_17, %c0_18] : memref<8x128xf32, #tpu.memory_space<vmem>>, vector<8x128xf32>
    tpu.vector_store %arg5[%c0_17, %c0_18], %82 {strides = array<i32>} : memref<8x128xf32, #tpu.memory_space<vmem>>, vector<8x128xf32>,
    %c0_19 = arith.constant 0 : index
    %c0_20 = arith.constant 0 : index
    %84 = vector.load %arg6[%c0_19, %c0_20] : memref<8x128xf32, #tpu.memory_space<vmem>>, vector<8x128xf32>
    %85 = arith.addf %84, %80 : vector<8x128xf32>
    %c0_21 = arith.constant 0 : index
    %c0_22 = arith.constant 0 : index
    %86 = vector.load %arg6[%c0_21, %c0_22] : memref<8x128xf32, #tpu.memory_space<vmem>>, vector<8x128xf32>
    tpu.vector_store %arg6[%c0_21, %c0_22], %85 {strides = array<i32>} : memref<8x128xf32, #tpu.memory_space<vmem>>, vector<8x128xf32>,
    %c0_i32_23 = arith.constant 0 : i32
    %87 = arith.cmpi eq, %arg1, %c0_i32_23 : i32
    %88 = arith.extui %87 : i1 to i32
    %c0_i32_24 = arith.constant 0 : i32
    %89 = arith.cmpi ne, %88, %c0_i32_24 : i32
    scf.if %89 {
      %c0_25 = arith.constant 0 : index
      %c0_26 = arith.constant 0 : index
      %90 = vector.load %arg5[%c0_25, %c0_26] : memref<8x128xf32, #tpu.memory_space<vmem>>, vector<8x128xf32>
      %cst = arith.constant dense<0.000000e+00> : vector<8xf32>
      %91 = vector.multi_reduction <add>, %90, %cst [1] : vector<8x128xf32> to vector<8xf32>
      %92 = vector.shape_cast %91 : vector<8xf32> to vector<8x1xf32>
      %c0_27 = arith.constant 0 : index
      %c0_28 = arith.constant 0 : index
      %93 = vector.load %arg6[%c0_27, %c0_28] : memref<8x128xf32, #tpu.memory_space<vmem>>, vector<8x128xf32>
      %cst_29 = arith.constant dense<0.000000e+00> : vector<8xf32>
      %94 = vector.multi_reduction <add>, %93, %cst_29 [1] : vector<8x128xf32> to vector<8xf32>
      %95 = vector.shape_cast %94 : vector<8xf32> to vector<8x1xf32>
      %96 = arith.subf %95, %92 : vector<8x1xf32>
      %cst_30 = arith.constant 1.000000e+00 : f32
      %97 = vector.broadcast %cst_30 : f32 to vector<8x1xf32>
      %98 = arith.addf %96, %97 : vector<8x1xf32>
      %99 = arith.divf %92, %98 : vector<8x1xf32>
      %100 = vector.shape_cast %99 : vector<8x1xf32> to vector<8x1xf32>
      %101 = vector.broadcast %100 : vector<8x1xf32> to vector<8x128xf32>
      %c0_31 = arith.constant 0 : index
      %c0_32 = arith.constant 0 : index
      %102 = vector.load %arg4[%c0_31, %c0_32] : memref<8x128xf32, #tpu.memory_space<vmem>>, vector<8x128xf32>
      tpu.vector_store %arg4[%c0_31, %c0_32], %101 {strides = array<i32>} : memref<8x128xf32, #tpu.memory_space<vmem>>, vector<8x128xf32>,
    } else {
    }
    return
  }
  func.func @transform_0(%arg0: i32, %arg1: i32) -> (i32, i32) {
    %c0_i32 = arith.constant 0 : i32
    return %arg0, %arg1 : i32, i32
  }
  func.func @transform_1(%arg0: i32, %arg1: i32) -> (i32, i32) {
    %c0_i32 = arith.constant 0 : i32
    return %arg0, %arg1 : i32, i32
  }
  func.func @transform_2(%arg0: i32, %arg1: i32) -> (i32, i32) {
    %c0_i32 = arith.constant 0 : i32
    %c0_i32_0 = arith.constant 0 : i32
    return %arg0, %c0_i32 : i32, i32
  }
}

</mosaic_0001>

<bundles_post_ra>
// kernel: tpu_custom_call.1
= control target key start
LH: loop header
LB: loop body
LE: loop exit
PB: predicated region body
PF: predicated region fallthrough
CT: control target
= control target key end

     0   :  { %7 = vsyncpa [#allocation5], 0  ;;  %s355_s0 = inlined_call_operand.hbm [shape: f32[8,2048], index: 0, kind: input, shape index: {}]   ;;  %s356_s1 = inlined_call_operand.hbm [shape: f32[8,2048], index: 1, kind: input, shape index: {}]   ;;  %s357_s2 = inlined_call_operand.hbm [shape: f32[8,128], index: 2, kind: output, shape index: {}]  }
   0x1   :  { %8 = vsyncpa [#allocation8], 0 }
   0x2   :  { %9 = vsyncpa [#allocation6], 0  ;;  %s15_s11 = sshll.u32 %s355_s0, 4  ;;  %s310_s12 = smov [#allocation4]   ;;  %s16_s11 = int_to_ptr.hbm [resolvable:$true] %s15_s11 }
   0x3   :  { %s17_s13 = sshll.u32 %s310_s12, 4  ;;  %s26_s16 = sshll.u32 %s356_s1, 4  ;;  %s18_s13 = int_to_ptr.vmem [resolvable:$true] %s17_s13  ;;  %s27_s16 = int_to_ptr.hbm [resolvable:$true] %s26_s16 }
   0x4   :  { %20 = dma.hbm_to_vmem [thread:$0]  %s16_s11, 2048, %s18_s13, [#allocation5]  }
   0x5   :  { %s311_s17 = smov [#allocation7]  }
   0x6   :  { %s28_s18 = sshll.u32 %s311_s17, 4  ;;  %s29_s18 = int_to_ptr.vmem [resolvable:$true] %s28_s18 }
   0x7   :  { %31 = dma.hbm_to_vmem [thread:$0]  %s27_s16, 2048, %s29_s18, [#allocation8]  }
   0x8   :  { %304 = dma.done.wait [#allocation5], 2048  }
   0x9   :  { %305 = vsyncadd [#allocation5], 4294965248 }
   0xa   :  { %306 = dma.done.wait [#allocation8], 2048  }
   0xb   :  { %307 = vsyncadd [#allocation8], 4294965248  ;;  %v46_v0 = vld [vmem:[#allocation4] sm:$0xff]  ;;  %v47_v1 = vld [vmem:[#allocation4 + $0x8] sm:$0xff]  ;;  %s312_s0 = smov [#allocation9]   ;;  %s216_s21 = sshll.u32 %s357_s2, 4  ;;  %s217_s21 = int_to_ptr.hbm [resolvable:$true] %s216_s21 }
   0xc   :  { %v48_v2 = vld [vmem:[#allocation4 + $0x10] sm:$0xff]  ;;  %v54_v3 = vld [vmem:[#allocation7] sm:$0xff]  ;;  %v49_v4 = vld [vmem:[#allocation4 + $0x18] sm:$0xff]  ;;  %v70_v16 = vmul.f32 %v46_v0, %v46_v0  ;;  %v71_v17 = vmul.f32 %v47_v1, %v47_v1  ;;  %s214_s1 = sshll.u32 %s312_s0, 4  ;;  %s215_s1 = int_to_ptr.vmem [resolvable:$true] %s214_s1 }
   0xd   :  { %v55_v5 = vld [vmem:[#allocation7 + $0x8] sm:$0xff]  ;;  %v56_v6 = vld [vmem:[#allocation7 + $0x10] sm:$0xff]  ;;  %v62_v7 = vmul.f32 %v54_v3, %v46_v0  ;;  %v50_v8 = vld [vmem:[#allocation4 + $0x20] sm:$0xff]  ;;  %v72_v21 = vmul.f32 %v48_v2, %v48_v2  ;;  %v73_v22 = vmul.f32 %v49_v4, %v49_v4  ;;  %v78_v33 = vmul.f32 %v54_v3, %v54_v3 }
   0xe   :  { %v51_v9 = vld [vmem:[#allocation4 + $0x28] sm:$0xff]  ;;  %v57_v10 = vld [vmem:[#allocation7 + $0x18] sm:$0xff]  ;;  %v63_v11 = vmul.f32 %v55_v5, %v47_v1  ;;  %v52_v12 = vld [vmem:[#allocation4 + $0x30] sm:$0xff]  ;;  %v64_v15 = vmul.f32 %v56_v6, %v48_v2  ;;  %v334_v23 = vmul.f32 %v50_v8, %v50_v8  ;;  %v79_v34 = vmul.f32 %v55_v5, %v55_v5 }
   0xf   :  { %v58_v13 = vld [vmem:[#allocation7 + $0x20] sm:$0xff]  ;;  %v59_v14 = vld [vmem:[#allocation7 + $0x28] sm:$0xff]  ;;  %v53_v18 = vld [vmem:[#allocation4 + $0x38] sm:$0xff]  ;;  %v336_v24 = vmul.f32 %v51_v9, %v51_v9  ;;  %v65_v25 = vmul.f32 %v57_v10, %v49_v4  ;;  %v338_v26 = vmul.f32 %v52_v12, %v52_v12  ;;  %v80_v39 = vmul.f32 %v56_v6, %v56_v6 }
  0x10   :  { %v60_v19 = vld [vmem:[#allocation7 + $0x30] sm:$0xff]  ;;  %v61_v20 = vld [vmem:[#allocation7 + $0x38] sm:$0xff]  ;;  %v340_v27 = vmul.f32 %v53_v18, %v53_v18  ;;  %v94_v28 = vadd.f32 %v63_v11, %v62_v7  ;;  %v114_v29 = vld [vmem:[#allocation4 + $0x40] sm:$0xff]  ;;  %v66_v31 = vmul.f32 %v58_v13, %v50_v8  ;;  %v67_v32 = vmul.f32 %v59_v14, %v51_v9 }
  0x11   :  { %v115_v30 = vld [vmem:[#allocation4 + $0x48] sm:$0xff]  ;;  %v122_v35 = vld [vmem:[#allocation7 + $0x40] sm:$0xff]  ;;  %v68_v37 = vmul.f32 %v60_v19, %v52_v12  ;;  %v342_v38 = vmul.f32 %v61_v20, %v53_v18  ;;  %v116_v41 = vld [vmem:[#allocation4 + $0x50] sm:$0xff]  ;;  %v81_v43 = vmul.f32 %v57_v10, %v57_v10  ;;  %v82_v44 = vmul.f32 %v58_v13, %v58_v13 }
  0x12   :  { %v123_v36 = vld [vmem:[#allocation7 + $0x48] sm:$0xff]  ;;  %v96_v40 = vadd.f32 %v94_v28, %v64_v15  ;;  %v124_v42 = vld [vmem:[#allocation7 + $0x50] sm:$0xff]  ;;  %v117_v45 = vld [vmem:[#allocation4 + $0x58] sm:$0xff]  ;;  %v130_v47 = vmul.f32 %v122_v35, %v114_v29  ;;  %v83_v49 = vmul.f32 %v59_v14, %v59_v14  ;;  %v84_v50 = vmul.f32 %v60_v19, %v60_v19 }
  0x13   :  { %v125_v46 = vld [vmem:[#allocation7 + $0x58] sm:$0xff]  ;;  %v131_v48 = vmul.f32 %v123_v36, %v115_v30  ;;  %v344_v51 = vmul.f32 %v61_v20, %v61_v20  ;;  %v118_v53 = vld [vmem:[#allocation4 + $0x60] sm:$0xff]  ;;  %v132_v55 = vmul.f32 %v124_v42, %v116_v41  ;;  %v138_v56 = vmul.f32 %v114_v29, %v114_v29  ;;  %v119_v60 = vld [vmem:[#allocation4 + $0x68] sm:$0xff] }
  0x14   :  { %v98_v52 = vadd.f32 %v96_v40, %v65_v25  ;;  %v126_v54 = vld [vmem:[#allocation7 + $0x60] sm:$0xff]  ;;  %v139_v57 = vmul.f32 %v115_v30, %v115_v30  ;;  %v140_v58 = vmul.f32 %v116_v41, %v116_v41  ;;  %v127_v61 = vld [vmem:[#allocation7 + $0x68] sm:$0xff]  ;;  %v133_v62 = vmul.f32 %v125_v46, %v117_v45  ;;  %v120_v10 = vld [vmem:[#allocation4 + $0x70] sm:$0xff] }
  0x15   :  { %v141_v63 = vmul.f32 %v117_v45, %v117_v45  ;;  %v146_v0 = vmul.f32 %v122_v35, %v122_v35  ;;  %v147_v1 = vmul.f32 %v123_v36, %v123_v36  ;;  %v148_v2 = vmul.f32 %v124_v42, %v124_v42  ;;  %v128_v11 = vld [vmem:[#allocation7 + $0x70] sm:$0xff]  ;;  %v121_v25 = vld [vmem:[#allocation4 + $0x78] sm:$0xff] }
  0x16   :  { %v100_v59 = vadd.f32 %v98_v52, %v66_v31  ;;  %v162_v3 = vadd.f32 %v131_v48, %v130_v47  ;;  %v86_v4 = vadd.f32 %v78_v33, %v70_v16  ;;  %v134_v5 = vmul.f32 %v126_v54, %v118_v53  ;;  %v129_v28 = vld [vmem:[#allocation7 + $0x78] sm:$0xff] }
  0x17   :  { %v142_v6 = vmul.f32 %v118_v53, %v118_v53  ;;  %v87_v7 = vadd.f32 %v79_v34, %v71_v17  ;;  %v88_v8 = vadd.f32 %v80_v39, %v72_v21  ;;  %v135_v12 = vmul.f32 %v127_v61, %v119_v60 }
  0x18   :  { %v102_v9 = vadd.f32 %v100_v59, %v67_v32  ;;  %v149_v13 = vmul.f32 %v125_v46, %v125_v46  ;;  %v164_v14 = vadd.f32 %v162_v3, %v132_v55  ;;  %v143_v15 = vmul.f32 %v119_v60, %v119_v60 }
  0x19   :  { %v89_v18 = vadd.f32 %v81_v43, %v73_v22  ;;  %v95_v19 = vadd.f32 %v87_v7, %v86_v4  ;;  %v154_v20 = vadd.f32 %v146_v0, %v138_v56  ;;  %v150_v29 = vmul.f32 %v126_v54, %v126_v54 }
  0x1a   :  { %v166_v30 = vadd.f32 %v164_v14, %v133_v62  ;;  %v155_v31 = vadd.f32 %v147_v1, %v139_v57  ;;  %v156_v16 = vadd.f32 %v148_v2, %v140_v58  ;;  %v136_v33 = vmul.f32 %v128_v11, %v120_v10 }
  0x1b   :  { %v151_v35 = vmul.f32 %v127_v61, %v127_v61  ;;  %v90_v17 = vadd.f32 %v82_v44, %v334_v23  ;;  %v97_v21 = vadd.f32 %v95_v19, %v88_v8  ;;  %v104_v32 = vadd.f32 %v102_v9, %v68_v37 }
  0x1c   :  { %v168_v34 = vadd.f32 %v166_v30, %v134_v5  ;;  %v157_v36 = vadd.f32 %v149_v13, %v141_v63  ;;  %v163_v39 = vadd.f32 %v155_v31, %v154_v20  ;;  %v137_v40 = vmul.f32 %v129_v28, %v121_v25 }
  0x1d   :  { %v144_v41 = vmul.f32 %v120_v10, %v120_v10  ;;  %v91_v22 = vadd.f32 %v83_v49, %v336_v24  ;;  %v99_v42 = vadd.f32 %v97_v21, %v89_v18  ;;  %v152_v43 = vmul.f32 %v128_v11, %v128_v11 }
  0x1e   :  { %v170_v45 = vadd.f32 %v168_v34, %v135_v12  ;;  %v158_v46 = vadd.f32 %v150_v29, %v142_v6  ;;  %v165_v47 = vadd.f32 %v163_v39, %v156_v16  ;;  %v145_v48 = vmul.f32 %v121_v25, %v121_v25 }
  0x1f   :  { %v153_v52 = vmul.f32 %v129_v28, %v129_v28  ;;  %v92_v53 = vadd.f32 %v84_v50, %v338_v26  ;;  %v101_v54 = vadd.f32 %v99_v42, %v90_v17  ;;  %v106_v23 = vadd.f32 %v104_v32, %v342_v38 }
  0x20   :  { %v172_v37 = vadd.f32 %v170_v45, %v136_v33  ;;  %v159_v44 = vadd.f32 %v151_v35, %v143_v15  ;;  %v167_v55 = vadd.f32 %v165_v47, %v157_v36  ;;  %v93_v24 = vadd.f32 %v344_v51, %v340_v27 }
  0x21   :  { %v103_v56 = vadd.f32 %v101_v54, %v91_v22  ;;  %v160_v49 = vadd.f32 %v152_v43, %v144_v41  ;;  %v161_v61 = vadd.f32 %v153_v52, %v145_v48 }
  0x22   :  { %v174_v57 = vadd.f32 %v172_v37, %v137_v40  ;;  %v169_v58 = vadd.f32 %v167_v55, %v158_v46 }
  0x23   :  { %v105_v59 = vadd.f32 %v103_v56, %v92_v53 }
  0x24   :  { %v177_v60 = vadd.f32 %v174_v57, %v106_v23  ;;  %v171_v62 = vadd.f32 %v169_v58, %v159_v44 }
  0x25   :  { %v107_v63 = vadd.f32 %v105_v59, %v93_v24 }
  0x26   :  { %186 = vadd.xlane.f32.xlu0 %v177_v60  ;;  %v173_v26 = vadd.f32 %v171_v62, %v160_v49 }
  0x28   :  { %v175_v50 = vadd.f32 %v173_v26, %v161_v61 }
  0x2a   :  { %v180_v0 = vadd.f32 %v175_v50, %v107_v63 }
  0x2e   :  { %189 = vadd.xlane.f32.xlu0 %v180_v0 }
  0x99   :  { %v187_v38 = vpop.xlane.xlu0 %186 }
  0xa1   :  { %v190_v1 = vpop.xlane.xlu0 %189 }
  0xa2   :  { %v191_v2 = vsub.f32 %v190_v1, %v187_v38 }
  0xa4   :  { %v192_v3 = vadd.f32 1.0, %v191_v2 }
  0xa6   :  { %230 = vrcp.f32 %v192_v3  ;;  %v204_v51 = vand.u32 2147483648, %v192_v3  ;;  %v202_v7 = vand.u32 2147483647, %v192_v3  ;;  %vm198_vm1 = vweird.f32 %v192_v3 }
  0xa8   :  { %v205_v9 = vor.u32 1.1754944e-38, %v204_v51  ;;  %vm203_vm3 = vcmp.eq.f32.partialorder %v202_v7, 8.507059e+37 }
  0xac   :  { %v231_v4 = vpop.eup %230 }
  0xad   :  { %v194_v5 = vmul.f32 %v231_v4, %v192_v3  ;;  %vm199_vm0 = vweird.f32 %v231_v4 }
  0xae   :  { %vm200_vm2 = vmor %vm198_vm1, %vm199_vm0 }
  0xaf   :  { %v195_v27 = vsub.f32 1.0, %v194_v5 }
  0xb1   :  { %v196_v6 = vmul.f32 %v231_v4, %v195_v27 }
  0xb3   :  { %v197_v8 = vadd.f32 %v231_v4, %v196_v6 }
  0xb5   :  { %v201_v10 = vsel %vm200_vm2, %v231_v4, %v197_v8 }
  0xb6   :  { %v206_v11 = vsel %vm203_vm3, %v205_v9, %v201_v10 }
  0xb7   :  { %v207_v12 = vmul.f32 %v206_v11, %v187_v38 }
  0xb9   :  { %208 = vst [vmem:[#allocation9] sm:$0xff] %v207_v12 }
  0xba   :  { %219 = dma.vmem_to_hbm [thread:$0]  %s215_s1, 128, %s217_s21, [#allocation6]  }
  0xbb   :  { %308 = dma.done.wait [#allocation6], 128  }
  0xbc   :  { %309 = vsyncadd [#allocation6], 4294967168 }
  0xbd   :  { %224 = vsyncpa [#allocation5], 1 }
  0xbe   :  { %225 = vsyncpa [#allocation8], 1 }
  0xbf   :  { %226 = vsyncpa [#allocation6], 1 }

</bundles_post_ra>
